<compile_context>
chip_gen: v5e
topology: v5e:2x2
jax: 0.10.0
libtpu: 0.0.40
codegen_flags: <defaults>
</compile_context>

<pallas_src>
import functools

import jax
import jax.numpy as jnp
from jax.experimental import pallas as pl
from jax.experimental.pallas import tpu as pltpu


# -----------------------------------------------------------------------------
# pltpu.roll orientation.  pltpu.roll follows jnp.roll semantics
# (result[q] == x[(q - shift) % N]) which corresponds to ROLL_BW_DEFAULT = -1
# in the convention below.  A one-time hardware probe is kept as a startup
# guard because every static shift constant baked into the fused kernel
# depends on this sign; it costs one tiny extra compile outside the hot path.
# -----------------------------------------------------------------------------
ROLL_BW_DEFAULT = -1


def _roll_probe_kernel(x_ref, o_ref):
    o_ref[...] = pltpu.roll(x_ref[...], 1, axis=1)


def detect_roll_backward():
    """Returns rb such that pltpu.roll(x, s, axis)[q] == x[(q + rb * s) % N]."""
    x = jnp.broadcast_to(jnp.arange(128, dtype=jnp.float32)[None, :], (8, 128))
    y = pl.pallas_call(
        _roll_probe_kernel,
        out_shape=jax.ShapeDtypeStruct((8, 128), jnp.float32),
    )(x)
    y = jax.device_get(y)
    # jnp.roll semantics (result[q] = x[q - s]) -> y[0, 1] == 0  ->  rb == -1.
    return -1 if abs(float(y[0, 1])) < 0.5 else 1


# -----------------------------------------------------------------------------
# Fused Pallas kernel: 4x (complex conv + complex BN + ReLU) + final conv +
# tanh + mask * noisy_spec, all resident in VMEM.
#
# Activation layout inside the kernel: (channels, W) where channels live on
# sublanes (layer 0: 8 rows, hidden layers: ch2 = 2*rep rows) and
# W = round_up(Tp*Fp, 128) flattened padded spatial positions live on lanes
# (flat index q = tp*Fp + fp).
# -----------------------------------------------------------------------------
def make_fc2n2d_kernel(*, ksize, pad, Fp, W, ch2, roll_bw):
    K = ksize

    # Tap (kh, kw) for output position q reads the input at
    #   q + (kh - pad)*Fp + (kw - pad).
    # Factored into one "row" rotation per kh (the only large modular
    # rotations) and one tiny "column" rotation per kw (kw == pad is free),
    # all applied to the bf16 activation buffer.
    row_shift = [(roll_bw * (kh - pad) * Fp) % W for kh in range(K)]
    col_shift = [(roll_bw * (kw - pad)) % W for kw in range(K)]

    # Reflect-'same' border rebuild: flat source offsets, F-direction fixes
    # first, then T-direction fixes (reflect padding is separable).  The mask
    # rows passed from the wrapper must follow the same order.
    fix_shift = (
        [(roll_bw * 2 * (j + 1)) % W for j in range(pad)] +        # left cols
        [(roll_bw * -2 * (j + 1)) % W for j in range(pad)] +       # right cols
        [(roll_bw * 2 * (j + 1) * Fp) % W for j in range(pad)] +   # top rows
        [(roll_bw * -2 * (j + 1) * Fp) % W for j in range(pad)])   # bottom rows
    n_fix = len(fix_shift)

    def kernel(x_ref, mask_ref, w0, a0, w1, a1, w2, a2, w3, a3, w4, b4,
               out_ref):
        # Border masks: loaded + converted to bool ONCE per grid step (hoisted
        # out of the per-layer reflect fix).
        fixes = [mask_ref[i:i + 1, :] != 0.0 for i in range(n_fix)]

        def conv(hb, w_ref):
            # Complex conv as 25 accumulating (cout, cin) @ (cin, W) matmuls:
            # no im2col slab is materialized (kills the per-layer VMEM
            # store/reload stream; v7x's MRB accumulates the partials in
            # place).  hb is bf16 so every rotation moves half the vregs of
            # the old f32 scheme.
            acc = None
            t = 0
            for kh in range(K):
                if row_shift[kh] == 0:
                    hrow = hb
                else:
                    hrow = pltpu.roll(hb, shift=row_shift[kh], axis=1)
                for kw in range(K):
                    if col_shift[kw] == 0:
                        tap = hrow
                    else:
                        tap = pltpu.roll(hrow, shift=col_shift[kw], axis=1)
                    d = jnp.dot(w_ref[t], tap,
                                preferred_element_type=jnp.float32)
                    acc = d if acc is None else acc + d
                    t += 1
            return acc

        def reflect_fix(yb):
            # Rebuild the reflect-'same' border of the bf16 activation from
            # its freshly computed interior so the next conv reads correct
            # padding.  Border values are only ever consumed as bf16 conv
            # inputs, so fixing the bf16 copy is exact.
            for i in range(n_fix):
                if fix_shift[i] == 0:
                    continue
                r = pltpu.roll(yb, shift=fix_shift[i], axis=1)
                yb = jnp.where(fixes[i], r, yb)
            return yb

        def block(hb, w_ref, a_ref):
            z = conv(hb, w_ref)                            # (ch2, W) f32
            # Complex BatchNorm (eval, pre-folded to a 2x2 real/imag affine):
            #   y = z * s1 + swap(z) * s2 + off,  swap = exchange real/imag
            # channel halves along sublanes -> sublane rotation by ch2 // 2.
            zs = pltpu.roll(z, shift=ch2 // 2, axis=0)
            y = jnp.maximum(z * a_ref[0] + zs * a_ref[1] + a_ref[2], 0.0)
            return reflect_fix(y.astype(jnp.bfloat16))

        # Layer-0 input already has wrapper-built reflect borders; cast to
        # bf16 once (all tap rotations operate on the bf16 copy).
        hb = x_ref[0].astype(jnp.bfloat16)
        hb = block(hb, w0, a0)
        hb = block(hb, w1, a1)
        hb = block(hb, w2, a2)
        hb = block(hb, w3, a3)

        # Final CConv2d -> Tanh -> mask * noisy_spec, restricted to the first
        # 8 sublanes (only rows 0..1 carry the single complex output channel;
        # x_ref rows >= 2 are zero, so rows 2..7 of the product are zero).
        z = conv(hb, w4)                                   # (8, W) f32
        out_ref[0] = jnp.tanh(z + b4[...]) * x_ref[0]

    return kernel


def fc2n2d_network(params, noisy_spec, *, ksize, roll_bw=ROLL_BW_DEFAULT):
    """noisy_spec: (B, T, F, 2) -> predict_spec (B, T, F, 2), one fused kernel."""
    B, T, F, C2 = noisy_spec.shape
    pad = (ksize - 1) // 2
    # Static geometry invariants the in-kernel roll scheme relies on.
    assert ksize % 2 == 1 and ksize == 2 * pad + 1, "odd 'same' kernel required"
    assert T > pad and F > pad, "reflect padding needs dim > pad"
    Tp, Fp = T + 2 * pad, F + 2 * pad
    nvalid = Tp * Fp
    npad = ((nvalid + 127) // 128) * 128
    assert nvalid - 1 < npad       # interior taps never wrap into pad lanes

    w0 = params["blocks"][0]["w"]
    ch2 = w0.shape[1]              # 2 * rep_channels
    cin0 = w0.shape[2]             # layer-0 input rows (sublane aligned)
    cfin = params["final"]["w"].shape[1]
    assert C2 <= cin0 and cin0 == cfin

    # Layer-0 input: channels-first, reflect-padded, flattened with the padded
    # row stride, zero-padded to cin0 sublanes / npad lanes.
    xc = jnp.moveaxis(noisy_spec, -1, 1)                          # (B, 2, T, F)
    xp = jnp.pad(xc, ((0, 0), (0, 0), (pad, pad), (pad, pad)), mode="reflect")
    xf = xp.reshape(B, C2, nvalid)
    xf = jnp.pad(xf, ((0, 0), (0, cin0 - C2), (0, npad - nvalid)))

    # Precomputed reflect-fix border masks (hoisted out of the kernel's
    # per-layer loop).  Row order must match fix_shift in the kernel:
    # left cols, right cols, top rows, bottom rows.
    q = jnp.arange(npad, dtype=jnp.int32)
    fcoord, tcoord = q % Fp, q // Fp
    valid = q < nvalid
    masks = ([valid & (fcoord == pad - 1 - j) for j in range(pad)] +
             [valid & (fcoord == pad + F + j) for j in range(pad)] +
             [valid & (tcoord == pad - 1 - j) for j in range(pad)] +
             [valid & (tcoord == pad + T + j) for j in range(pad)])
    mask = jnp.stack(masks, axis=0).astype(jnp.float32)           # (4*pad, npad)

    kernel = make_fc2n2d_kernel(ksize=ksize, pad=pad, Fp=Fp, W=npad,
                                ch2=ch2, roll_bw=roll_bw)

    def const_spec(a):
        if a.ndim == 2:
            return pl.BlockSpec(a.shape, lambda b: (0, 0))
        return pl.BlockSpec(a.shape, lambda b: (0, 0, 0))

    blk = params["blocks"]
    fin = params["final"]
    args = [xf, mask,
            blk[0]["w"], blk[0]["aff"],
            blk[1]["w"], blk[1]["aff"],
            blk[2]["w"], blk[2]["aff"],
            blk[3]["w"], blk[3]["aff"],
            fin["w"], fin["b"]]
    in_specs = [pl.BlockSpec((1, cin0, npad), lambda b: (b, 0, 0))] + \
               [const_spec(a) for a in args[1:]]

    out = pl.pallas_call(
        kernel,
        out_shape=jax.ShapeDtypeStruct((B, cfin, npad), jnp.float32),
        grid=(B,),
        in_specs=in_specs,
        out_specs=pl.BlockSpec((1, cfin, npad), lambda b: (b, 0, 0)),
        compiler_params=pltpu.CompilerParams(
            dimension_semantics=("parallel",)),
    )(*args)

    pred = out[:, :C2, :nvalid].reshape(B, C2, Tp, Fp)[
        :, :, pad:pad + T, pad:pad + F]
    return jnp.moveaxis(pred, 1, -1)                              # (B, T, F, 2)


# -----------------------------------------------------------------------------
# Parameter construction / packing (deterministic, synthetic)
# -----------------------------------------------------------------------------
def combine_complex_weight(wr, wi):
    # (K,K,Cin,Cout) each -> real conv weight (K,K,2Cin,2Cout):
    #   out_real = Wr*x_r - Wi*x_i ;  out_imag = Wi*x_r + Wr*x_i
    top = jnp.concatenate([wr, wi], axis=-1)    # rows = real input channels
    bot = jnp.concatenate([-wi, wr], axis=-1)   # rows = imag input channels
    return jnp.concatenate([top, bot], axis=-2)


def pack_conv_weight_taps(wc, cin_pad, cout_pad):
    """(K, K, Cin2, Cout2) -> bf16 (K*K, cout_pad, cin_pad), kh-major taps."""
    Kh, Kw, cin2, cout2 = wc.shape
    wc = jnp.pad(wc, ((0, 0), (0, 0), (0, cin_pad - cin2),
                      (0, cout_pad - cout2)))
    w = jnp.transpose(wc, (0, 1, 3, 2)).reshape(Kh * Kw, cout_pad, cin_pad)
    return w.astype(jnp.bfloat16)


def init_cconv_params(key, cin, cout, K):
    k1, k2, k3 = jax.random.split(key, 3)
    scale = 1.0 / jnp.sqrt(jnp.float32(cin * K * K))
    wr = jax.random.normal(k1, (K, K, cin, cout), jnp.float32) * scale
    wi = jax.random.normal(k2, (K, K, cin, cout), jnp.float32) * scale
    bias = jax.random.normal(k3, (2 * cout,), jnp.float32) * 0.01
    return combine_complex_weight(wr, wi), bias


def init_cbn_params(key, cout):
    ks = jax.random.split(key, 8)
    g = 1.0 / jnp.sqrt(2.0)
    return dict(
        gamma_rr=g + 0.01 * jax.random.normal(ks[0], (cout,), jnp.float32),
        gamma_ii=g + 0.01 * jax.random.normal(ks[1], (cout,), jnp.float32),
        gamma_ri=0.01 * jax.random.normal(ks[2], (cout,), jnp.float32),
        beta_r=0.01 * jax.random.normal(ks[3], (cout,), jnp.float32),
        beta_i=0.01 * jax.random.normal(ks[4], (cout,), jnp.float32),
        mean_r=0.01 * jax.random.normal(ks[5], (cout,), jnp.float32),
        mean_i=0.01 * jax.random.normal(ks[6], (cout,), jnp.float32),
        Vrr=g * jnp.ones((cout,), jnp.float32),
        Vii=g * jnp.ones((cout,), jnp.float32),
        Vri=0.05 * jax.random.uniform(ks[7], (cout,), jnp.float32,
                                      minval=-1.0, maxval=1.0),
    )


def fold_cbn(bias, bn, eps=1e-5):
    """Fold complex BatchNorm (Deep Complex Networks whitening, eval mode)
    plus conv bias into a per-channel 2x2 real/imag affine."""
    Vrr = bn["Vrr"] + eps
    Vii = bn["Vii"] + eps
    Vri = bn["Vri"]
    s = jnp.sqrt(Vrr * Vii - Vri * Vri)
    t = jnp.sqrt(Vrr + Vii + 2.0 * s)
    inv_st = 1.0 / (s * t)
    Wrr = (Vii + s) * inv_st
    Wii = (Vrr + s) * inv_st
    Wri = -Vri * inv_st
    A_rr = bn["gamma_rr"] * Wrr + bn["gamma_ri"] * Wri
    A_ri = bn["gamma_rr"] * Wri + bn["gamma_ri"] * Wii
    A_ir = bn["gamma_ri"] * Wrr + bn["gamma_ii"] * Wri
    A_ii = bn["gamma_ri"] * Wri + bn["gamma_ii"] * Wii
    cout = Vrr.shape[0]
    br = bias[:cout] - bn["mean_r"]
    bi = bias[cout:] - bn["mean_i"]
    B_r = bn["beta_r"] + A_rr * br + A_ri * bi
    B_i = bn["beta_i"] + A_ir * br + A_ii * bi
    s1 = jnp.concatenate([A_rr, A_ii]).astype(jnp.float32)
    s2 = jnp.concatenate([A_ri, A_ir]).astype(jnp.float32)
    off = jnp.concatenate([B_r, B_i]).astype(jnp.float32)
    return s1, s2, off


def init_fc2n2d_params(key, rep_channels, K, num_in_complex=1):
    ch2 = 2 * rep_channels
    cin0 = max(8, 2 * num_in_complex)     # sublane-aligned layer-0 input rows
    cfin = 8                              # final output rows (only 2 used)
    blocks = []
    cin = num_in_complex
    cin_rows = cin0
    for _ in range(4):
        key, kw_, kb = jax.random.split(key, 3)
        wc, bias = init_cconv_params(kw_, cin, rep_channels, K)
        bn = init_cbn_params(kb, rep_channels)
        s1, s2, off = fold_cbn(bias, bn)
        blocks.append(dict(
            w=pack_conv_weight_taps(wc, cin_rows, ch2),   # (K*K, ch2, cin_rows)
            aff=jnp.stack([s1, s2, off], axis=0)[:, :, None],  # (3, ch2, 1)
        ))
        cin = rep_channels
        cin_rows = ch2
    key, kf = jax.random.split(key)
    wcf, bias_f = init_cconv_params(kf, rep_channels, 1, K)       # (K,K,ch2,2)
    final = dict(
        w=pack_conv_weight_taps(wcf, ch2, cfin),                  # (K*K, 8, ch2)
        b=jnp.pad(bias_f, (0, cfin - 2))[:, None].astype(jnp.float32),  # (8,1)
    )
    return dict(blocks=blocks, final=final)


# -----------------------------------------------------------------------------
# Pure-JAX reference of the fused network (used only for a correctness check;
# mirrors the kernel's bf16 matmul operands / f32 per-tap accumulation).
# -----------------------------------------------------------------------------
def ref_cconv(h, w_taps, ksize, pad):
    B, T, F, C = h.shape
    cin_rows = w_taps.shape[2]
    hp = jnp.pad(h, ((0, 0), (pad, pad), (pad, pad), (0, 0)), mode="reflect")
    if cin_rows > C:
        hp = jnp.pad(hp, ((0, 0), (0, 0), (0, 0), (0, cin_rows - C)))
    hp = hp.astype(jnp.bfloat16)
    z = None
    t = 0
    for kh in range(ksize):
        for kw in range(ksize):
            patch = hp[:, kh:kh + T, kw:kw + F, :]
            d = jnp.einsum("btfc,oc->btfo", patch, w_taps[t],
                           preferred_element_type=jnp.float32)
            z = d if z is None else z + d
            t += 1
    return z


def ref_network(params, noisy_spec, *, ksize):
    pad = (ksize - 1) // 2
    h = noisy_spec
    for blk in params["blocks"]:
        z = ref_cconv(h, blk["w"], ksize, pad)
        cpl = z.shape[-1] // 2
        zs = jnp.concatenate([z[..., cpl:], z[..., :cpl]], axis=-1)
        aff = blk["aff"][:, :, 0]
        h = jnp.maximum(z * aff[0] + zs * aff[1] + aff[2], 0.0)
    fin = params["final"]
    z = ref_cconv(h, fin["w"], ksize, pad)
    mask = jnp.tanh(z + fin["b"][:, 0])[..., :noisy_spec.shape[-1]]
    return mask * noisy_spec


# -----------------------------------------------------------------------------
# STFT / iSTFT glue (compute_stft / resynth are injected objects in PyTorch)
# -----------------------------------------------------------------------------
def compute_features(x, n_fft, hop):
    """x: (B, L, C) waveform -> (B, T, F, 2*C) with [real | imag] channels."""
    B, L, C = x.shape
    win = jnp.hanning(n_fft).astype(jnp.float32)
    T = 1 + (L - n_fft) // hop
    idx = jnp.arange(T)[:, None] * hop + jnp.arange(n_fft)[None, :]
    framed = x.transpose(0, 2, 1)[:, :, idx] * win           # (B, C, T, n_fft)
    sp = jnp.fft.rfft(framed, axis=-1)                        # (B, C, T, F)
    real = jnp.real(sp).transpose(0, 2, 3, 1)                 # (B, T, F, C)
    imag = jnp.imag(sp).transpose(0, 2, 3, 1)
    return jnp.concatenate([real, imag], axis=-1).astype(jnp.float32)


def resynth(pred_spec, sig_length, n_fft, hop):
    """pred_spec: (B, T, F, 2) -> waveform (B, sig_length, 1) via ISTFT/OLA."""
    B, T, F, _ = pred_spec.shape
    comp = pred_spec[..., 0] + 1j * pred_spec[..., 1]         # (B, T, F)
    frames = jnp.fft.irfft(comp, n=n_fft, axis=-1)            # (B, T, n_fft)
    win = jnp.hanning(n_fft).astype(jnp.float32)
    frames = frames * win
    out_len = (T - 1) * hop + n_fft
    idx = (jnp.arange(T)[:, None] * hop + jnp.arange(n_fft)[None, :]).reshape(-1)
    sig = jnp.zeros((B, out_len), jnp.float32).at[:, idx].add(
        frames.reshape(B, -1))
    wsum = jnp.zeros((out_len,), jnp.float32).at[idx].add(
        jnp.tile(win * win, (T,)))
    sig = sig / jnp.maximum(wsum, 1e-8)
    sig = sig[:, :sig_length]
    if sig.shape[1] < sig_length:
        sig = jnp.pad(sig, ((0, 0), (0, sig_length - sig.shape[1])))
    return sig[..., None]


# -----------------------------------------------------------------------------
# Forward pass (mirrors FC2N2D.forward)
# -----------------------------------------------------------------------------
def fc2n2d_forward(params, noisy_wavs, *, n_fft, hop, ksize,
                   roll_bw=ROLL_BW_DEFAULT):
    length = noisy_wavs.shape[1]
    x = noisy_wavs
    # TODO(synk): self.resample (julius.resample_frac 1->2) skipped (identity);
    # the trailing 2->1 resample's result is discarded in the PyTorch forward.
    noisy_spec = compute_features(x, n_fft, hop)              # (B, T, F, 2)
    predict_spec = fc2n2d_network(params, noisy_spec, ksize=ksize,
                                  roll_bw=roll_bw)
    return resynth(predict_spec, length, n_fft, hop)


if __name__ == "__main__":
    REP_CHANNELS = 8
    KSIZE = 5
    N_FFT = 32
    HOP = 16
    B, L = 2, 512

    key = jax.random.PRNGKey(0)
    kp, kx = jax.random.split(key)
    params = init_fc2n2d_params(kp, REP_CHANNELS, KSIZE)
    noisy_wavs = jax.random.normal(kx, (B, L, 1), jnp.float32)

    # One-time startup guard for the hard-coded roll direction.
    roll_bw = detect_roll_backward()
    assert roll_bw in (-1, 1)

    # Correctness check: fused Pallas network vs pure-JAX reference.
    noisy_spec = compute_features(noisy_wavs, N_FFT, HOP)
    net = jax.jit(functools.partial(fc2n2d_network, ksize=KSIZE,
                                    roll_bw=roll_bw))
    pred_pallas = jax.block_until_ready(net(params, noisy_spec))
    pred_ref = jax.jit(functools.partial(ref_network, ksize=KSIZE))(
        params, noisy_spec)
    assert pred_pallas.shape == pred_ref.shape
    max_err = float(jnp.max(jnp.abs(pred_pallas - pred_ref)))
    assert bool(jnp.allclose(pred_pallas, pred_ref, rtol=2e-2, atol=2e-2)), \
        max_err

    fwd = jax.jit(functools.partial(fc2n2d_forward, n_fft=N_FFT, hop=HOP,
                                    ksize=KSIZE, roll_bw=roll_bw))
    x_hat = jax.block_until_ready(fwd(params, noisy_wavs))
    assert x_hat.shape == (B, L, 1), x_hat.shape
    assert bool(jnp.all(jnp.isfinite(x_hat)))
    print("KERNEL_OK")
</pallas_src>

<mosaic_0001>
module attributes {stable_mosaic.version = 11 : i64} {
  func.func @_roll_probe_kernel(%arg0: memref<8x128xf32, #tpu.memory_space<vmem>>, %arg1: memref<8x128xf32, #tpu.memory_space<vmem>>) attributes {dimension_semantics = [], scalar_prefetch = 0 : i64, scratch_operands = 0 : i64, tpu.core_type = #tpu.core_type<tc>} {
    %c0 = arith.constant 0 : index
    %c0_0 = arith.constant 0 : index
    %0 = vector.load %arg0[%c0, %c0_0] : memref<8x128xf32, #tpu.memory_space<vmem>>, vector<8x128xf32>
    %c1_i32 = arith.constant 1 : i32
    %1 = tpu.dynamic_rotate %0 by %c1_i32 dim 1 : vector<8x128xf32>, i32 -> vector<8x128xf32>
    %c0_1 = arith.constant 0 : index
    %c0_2 = arith.constant 0 : index
    %2 = vector.load %arg1[%c0_1, %c0_2] : memref<8x128xf32, #tpu.memory_space<vmem>>, vector<8x128xf32>
    tpu.vector_store %arg1[%c0_1, %c0_2], %1 {strides = array<i32>} : memref<8x128xf32, #tpu.memory_space<vmem>>, vector<8x128xf32>,
    return
  }
}

</mosaic_0001>

<bundles_post_ra>
// kernel: tpu_custom_call.1
= control target key start
LH: loop header
LB: loop body
LE: loop exit
PB: predicated region body
PF: predicated region fallthrough
CT: control target
= control target key end

     0   :  { %6 = vsyncpa [#allocation3], 0  ;;  %s118_s0 = inlined_call_operand.hbm [shape: f32[8,128], index: 0, kind: input, shape index: {}]   ;;  %s119_s1 = inlined_call_operand.hbm [shape: f32[8,128], index: 1, kind: output, shape index: {}]  }
   0x1   :  { %7 = vsyncpa [#allocation4], 0  ;;  %s13_s8 = sshll.u32 %s118_s0, 4  ;;  %s99_s9 = smov [#allocation2]   ;;  %s14_s8 = int_to_ptr.hbm [resolvable:$true] %s13_s8 }
   0x2   :  { %s15_s10 = sshll.u32 %s99_s9, 4  ;;  %s16_s10 = int_to_ptr.vmem [resolvable:$true] %s15_s10 }
   0x3   :  { %18 = dma.hbm_to_vmem [thread:$0]  %s14_s8, 128, %s16_s10, [#allocation3]  }
   0x4   :  { %95 = dma.done.wait [#allocation3], 128  }
   0x5   :  { %96 = vsyncadd [#allocation3], 4294967168  ;;  %v23_v0 = vld [vmem:[#allocation2] sm:$0xff]  ;;  %s100_s11 = smov 1   ;;  %s101_s12 = smov [#allocation5]  }
   0x6   :  { %24 = vrot.lane.b32.xlu0 %v23_v0, %s100_s11  ;;  %s32_s13 = sshll.u32 %s101_s12, 4  ;;  %s34_s16 = sshll.u32 %s119_s1, 4  ;;  %s33_s13 = int_to_ptr.vmem [resolvable:$true] %s32_s13  ;;  %s35_s16 = int_to_ptr.hbm [resolvable:$true] %s34_s16 }
  0x78   :  { %v25_v1 = vpop.permute.xlu0 %24 }
  0x79   :  { %26 = vst [vmem:[#allocation5] sm:$0xff] %v25_v1 }
  0x7a   :  { %37 = dma.vmem_to_hbm [thread:$0]  %s33_s13, 128, %s35_s16, [#allocation4]  }
  0x7b   :  { %97 = dma.done.wait [#allocation4], 128  }
  0x7c   :  { %98 = vsyncadd [#allocation4], 4294967168 }
  0x7d   :  { %42 = vsyncpa [#allocation3], 1 }
  0x7e   :  { %43 = vsyncpa [#allocation4], 1 }

</bundles_post_ra>
